<compile_context>
chip_gen: v7x
topology: tpu7x:2x2x1
jax: 0.10.0
libtpu: 0.0.40
codegen_flags: <defaults>
</compile_context>

<pallas_src>
import functools

import jax
import jax.numpy as jnp
from jax import lax
from jax.experimental import pallas as pl
from jax.experimental.pallas import tpu as pltpu

_LANE = 128
_BLOCK_BUDGET_BYTES = 8 * 1024 * 1024   # padded input block; x2 when double-buffered
_VMEM_LIMIT_BYTES = 32 * 1024 * 1024    # >= v5e default (16 MiB), == v6e/v7x default


def _min_identity(dtype):
    """Identity element for a min-reduction in `dtype` (used to mask OOB rows)."""
    dtype = jnp.dtype(dtype)
    if jnp.issubdtype(dtype, jnp.floating):
        return jnp.array(jnp.inf, dtype)
    if jnp.issubdtype(dtype, jnp.integer):
        return jnp.array(jnp.iinfo(dtype).max, dtype)
    if dtype == jnp.dtype(jnp.bool_):
        return jnp.array(True, dtype)
    raise TypeError(f"unsupported dtype for min reduction: {dtype}")


def _round_up(x, m):
    return ((x + m - 1) // m) * m


def _min_readout_kernel(x_ref, o_ref, *, seq_len, block_s, mask_ragged_s):
    # x_ref: (TB, TS, TH) input tile; o_ref: (TB, TH) resident accumulator.
    s = pl.program_id(2)
    x = x_ref[...]
    if mask_ragged_s:
        # Last S tile is ragged: neutralize out-of-bounds rows before reducing.
        row = lax.broadcasted_iota(jnp.int32, x.shape, dimension=1)
        valid = (s * block_s + row) < seq_len
        x = jnp.where(valid, x, _min_identity(x.dtype))
    tile_min = jnp.min(x, axis=1)  # reduce over the sequence tile (hidden by DMA)

    @pl.when(s == 0)
    def _init():
        o_ref[...] = tile_min

    @pl.when(s > 0)
    def _accum():
        o_ref[...] = jnp.minimum(o_ref[...], tile_min)


def _choose_tiles(B, S, H, itemsize, force_ts=None):
    # Dtype-aware sublane granularity: 8 (f32) / 16 (bf16,f16) / 32 (int8,fp8).
    sub = max(8, 32 // itemsize)

    # Batch block: outer dim of the input block, sublane dim of the output block.
    # Must be a multiple of 8 or equal B -> use B when small, else `sub`.
    TB = B if B <= sub else sub

    # Hidden (lane) block: full dim when it fits, else a lane-dense multiple of 128.
    TH = H if H <= 512 else 512

    # Guarantee >=2 blocks on a "parallel" axis when possible so v7x's 2 TCs
    # both get work (no-op on v5e/v6e). B can only be split in multiples of 8,
    # so the practical lever here is H.
    if pl.cdiv(B, TB) == 1 and pl.cdiv(H, TH) == 1 and H > _LANE:
        TH = max(_LANE, ((H // 2) // _LANE) * _LANE)

    # Sequence block: size so the *padded* double-buffered input block fits the
    # budget (TH padded to 128 lanes, TS stepped by the sublane multiple).
    padded_row_bytes = TB * _round_up(TH, _LANE) * itemsize
    ts_cap = max(sub, (_BLOCK_BUDGET_BYTES // padded_row_bytes) // sub * sub)

    if force_ts is not None:
        TS = force_ts          # testing hook (must be a multiple of 8)
    elif S <= ts_cap:
        TS = S                 # single S step; "full dim" satisfies layout rules
    else:
        TS = ts_cap            # multiple of `sub`; ragged tail handled by masking
    return TB, TS, TH


def min_readout(seq: jax.Array, *, _force_ts=None) -> jax.Array:
    """Pallas equivalent of MinReadout.forward: min over axis 1 of (B, S, H)."""
    B, S, H = seq.shape
    itemsize = jnp.dtype(seq.dtype).itemsize
    TB, TS, TH = _choose_tiles(B, S, H, itemsize, force_ts=_force_ts)
    grid = (pl.cdiv(B, TB), pl.cdiv(H, TH), pl.cdiv(S, TS))
    mask_ragged_s = (S % TS) != 0

    kernel = functools.partial(
        _min_readout_kernel, seq_len=S, block_s=TS, mask_ragged_s=mask_ragged_s
    )

    # Pure-bandwidth hint for the XLA scheduler.
    cost = pl.CostEstimate(
        flops=B * S * H,
        transcendentals=0,
        bytes_accessed=(B * S * H + B * H) * itemsize,
    )

    return pl.pallas_call(
        kernel,
        out_shape=jax.ShapeDtypeStruct((B, H), seq.dtype),
        grid=grid,
        in_specs=[pl.BlockSpec((TB, TS, TH), lambda b, h, s: (b, s, h))],
        # index_map ignores s -> output block stays resident across the
        # reduction axis and serves as the accumulator.
        out_specs=pl.BlockSpec((TB, TH), lambda b, h, s: (b, h)),
        compiler_params=pltpu.CompilerParams(
            dimension_semantics=("parallel", "parallel", "arbitrary"),
            vmem_limit_bytes=_VMEM_LIMIT_BYTES,
        ),
        cost_estimate=cost,
    )(seq)


if __name__ == "__main__":
    # MinReadout has no parameters (__init__ defines none).
    key = jax.random.PRNGKey(0)
    B, S, H = 2, 8, 32  # small shapes consistent with the module's forward
    seq = jax.random.normal(key, (B, S, H), dtype=jnp.float32)

    out = jax.block_until_ready(min_readout(seq))
    ref = jnp.min(seq, axis=1)  # == torch.min(seq, 1).values
    assert out.shape == (B, H), out.shape
    assert jnp.allclose(out, ref), "mismatch vs reference reduction"

    # Exercise the ragged-S masked path (forced TS so cdiv(S, TS) > 1 with a tail).
    seq2 = jax.random.normal(jax.random.PRNGKey(1), (2, 24, 32), dtype=jnp.float32)
    out2 = jax.block_until_ready(min_readout(seq2, _force_ts=16))
    assert jnp.allclose(out2, jnp.min(seq2, axis=1)), "mismatch on ragged-S path"

    print("KERNEL_OK")
</pallas_src>

<mosaic_0001>
module attributes {stable_mosaic.version = 11 : i64} {
  func.func @_min_readout_kernel(%arg0: i32, %arg1: i32, %arg2: i32, %arg3: memref<2x8x32xf32, #tpu.memory_space<vmem>>, %arg4: memref<2x32xf32, #tpu.memory_space<vmem>>) attributes {dimension_semantics = [#tpu.dimension_semantics<parallel>, #tpu.dimension_semantics<parallel>, #tpu.dimension_semantics<arbitrary>], iteration_bounds = array<i64: 1, 1, 1>, scalar_prefetch = 0 : i64, scratch_operands = 0 : i64, tpu.core_type = #tpu.core_type<tc>, window_params = [{transform_indices = @transform_0, window_bounds = array<i64: 2, 8, 32>}, {transform_indices = @transform_1, window_bounds = array<i64: 2, 32>}]} {
    %c0 = arith.constant 0 : index
    %c0_0 = arith.constant 0 : index
    %c0_1 = arith.constant 0 : index
    %0 = vector.load %arg3[%c0, %c0_0, %c0_1] : memref<2x8x32xf32, #tpu.memory_space<vmem>>, vector<2x8x32xf32>
    %cst = arith.constant dense<0x7F800000> : vector<2x32xf32>
    %1 = vector.multi_reduction <minimumf>, %0, %cst [1] : vector<2x8x32xf32> to vector<2x32xf32>
    %c0_i32 = arith.constant 0 : i32
    %2 = arith.cmpi eq, %arg2, %c0_i32 : i32
    %3 = arith.extui %2 : i1 to i32
    %c0_i32_2 = arith.constant 0 : i32
    %4 = arith.cmpi ne, %3, %c0_i32_2 : i32
    scf.if %4 {
      %c0_5 = arith.constant 0 : index
      %c0_6 = arith.constant 0 : index
      %8 = vector.load %arg4[%c0_5, %c0_6] : memref<2x32xf32, #tpu.memory_space<vmem>>, vector<2x32xf32>
      tpu.vector_store %arg4[%c0_5, %c0_6], %1 {strides = array<i32>} : memref<2x32xf32, #tpu.memory_space<vmem>>, vector<2x32xf32>,
    } else {
    }
    %c0_i32_3 = arith.constant 0 : i32
    %5 = arith.cmpi sgt, %arg2, %c0_i32_3 : i32
    %6 = arith.extui %5 : i1 to i32
    %c0_i32_4 = arith.constant 0 : i32
    %7 = arith.cmpi ne, %6, %c0_i32_4 : i32
    scf.if %7 {
      %c0_5 = arith.constant 0 : index
      %c0_6 = arith.constant 0 : index
      %8 = vector.load %arg4[%c0_5, %c0_6] : memref<2x32xf32, #tpu.memory_space<vmem>>, vector<2x32xf32>
      %9 = arith.minimumf %8, %1 : vector<2x32xf32>
      %c0_7 = arith.constant 0 : index
      %c0_8 = arith.constant 0 : index
      %10 = vector.load %arg4[%c0_7, %c0_8] : memref<2x32xf32, #tpu.memory_space<vmem>>, vector<2x32xf32>
      tpu.vector_store %arg4[%c0_7, %c0_8], %9 {strides = array<i32>} : memref<2x32xf32, #tpu.memory_space<vmem>>, vector<2x32xf32>,
    } else {
    }
    return
  }
  func.func @transform_0(%arg0: i32, %arg1: i32, %arg2: i32) -> (i32, i32, i32) {
    %c0_i32 = arith.constant 0 : i32
    return %arg0, %arg2, %arg1 : i32, i32, i32
  }
  func.func @transform_1(%arg0: i32, %arg1: i32, %arg2: i32) -> (i32, i32) {
    %c0_i32 = arith.constant 0 : i32
    return %arg0, %arg1 : i32, i32
  }
}

</mosaic_0001>

<bundles_post_ra>
// kernel: tpu_custom_call.1
= control target key start
LH: loop header
LB: loop body
LE: loop exit
PB: predicated region body
PF: predicated region fallthrough
CT: control target
= control target key end

     0   :  { %6 = vsyncpa [#allocation3], 0  ;;  %s169_s0 = inlined_call_operand.hbm [shape: f32[2,8,32], index: 0, kind: input, shape index: {}]   ;;  %s170_s1 = inlined_call_operand.hbm [shape: f32[2,32], index: 1, kind: output, shape index: {}]  }
   0x1   :  { %7 = vsyncpa [#allocation4], 0  ;;  %s131_s6 = smov [#allocation2]   ;;  %s83_s10 = scalar_lea.hbm %s169_s0, 256 }
   0x2   :  { %s13_s7 = sshll.u32 %s131_s6, 4  ;;  %p84_p0 = scmp.ne.s32.totalorder %s169_s0, %s83_s10  ;;  %s14_s7 = int_to_ptr.vmem [resolvable:$true] %s13_s7 }
   0x3   :  { %p87_p1 = scmp.lt.u32.totalorder %s83_s10, %s169_s0 }
   0x5   :  { %p89_p2 = pnand %p87_p1, %p84_p0 }
   0x7   :  { %92 = shalt.err (!%p89_p2)
}
   0x8   :  { %s93_s15 = scalar_lea.vmem %s14_s7, 256  ;;  %p98_p4 = scmp.lt.s32.totalorder %s14_s7, %s14_s7 }
   0x9   :  { %p94_p3 = scmp.ne.s32.totalorder %s14_s7, %s93_s15  ;;  %p99_p5 = scmp.lt.s32.totalorder %s93_s15, %s93_s15 }
   0xb   :  { %p100_p6 = por %p99_p5, %p98_p4 }
   0xd   :  { %p101_p7 = pnand %p100_p6, %p94_p3 }
   0xf   :  { %104 = shalt.err (!%p101_p7)
}
  0x10   :  { %s132_s16 = smov 128   ;;  %s133_s17 = smov 8  }
  0x11   :  { %19 = dma.hbm_to_vmem [thread:$0]  %s169_s0, 256, %s14_s7, [#allocation3], %s132_s16, %s132_s16, %s133_s17  }
  0x12   :  { %127 = dma.done.wait [#allocation3], 256  }
  0x13   :  { %128 = vsyncadd [#allocation3], 4294967040  ;;  %vm25_vm0 = vcmask 261120   ;;  %v23_v0 = vld [vmem:[#allocation2] sm:$0xff]  ;;  %v24_v1 = vld [vmem:[#allocation2 + $0x8] sm:$0xff]  ;;  %s134_s20 = smov [#allocation5]  }
  0x14   :  { %v26_v2 = vsel %vm25_vm0, %v23_v0, inf  ;;  %v33_v3 = vsel %vm25_vm0, %v24_v1, inf  ;;  %s70_s21 = sshll.u32 %s134_s20, 4  ;;  %vm46_vm1 = vcmask 1041409   ;;  %vm49_vm2 = vcmask 254976   ;;  %s71_s21 = int_to_ptr.vmem [resolvable:$true] %s70_s21 }
  0x15   :  { %v27_v4 = vrot.slane %v26_v2, 4  ;;  %v34_v5 = vrot.slane %v33_v3, 4  ;;  %s105_s0 = scalar_lea.vmem %s71_s21, 32  ;;  %p110_p9 = scmp.lt.s32.totalorder %s71_s21, %s71_s21 }
  0x16   :  { %p106_p8 = scmp.ne.s32.totalorder %s71_s21, %s105_s0  ;;  %p111_p10 = scmp.lt.s32.totalorder %s105_s0, %s105_s0 }
  0x17   :  { %v28_v6 = vmin.f32 %v26_v2, %v27_v4  ;;  %v35_v7 = vmin.f32 %v33_v3, %v34_v5 }
  0x18   :  { %p112_p11 = por %p111_p10, %p110_p9 }
  0x19   :  { %v29_v8 = vrot.slane %v28_v6, 2  ;;  %v36_v9 = vrot.slane %v35_v7, 2 }
  0x1a   :  { %p113_p12 = pnand %p112_p11, %p106_p8 }
  0x1b   :  { %v30_v10 = vmin.f32 %v28_v6, %v29_v8  ;;  %v37_v11 = vmin.f32 %v35_v7, %v36_v9 }
  0x1d   :  { %v31_v12 = vrot.slane %v30_v10, 1  ;;  %v38_v13 = vrot.slane %v37_v11, 1 }
  0x1f   :  { %v32_v14 = vmin.f32 %v30_v10, %v31_v12  ;;  %v39_v15 = vmin.f32 %v37_v11, %v38_v13 }
  0x21   :  { %v47_v16 = vsel %vm46_vm1, %v39_v15, %v32_v14 }
  0x22   :  { %50 = vst.msk [vmem:[#allocation5] sm:$0x3] %vm49_vm2, %v47_v16 }
  0x23   :  { %116 = shalt.err (!%p113_p12)
}
  0x24   :  { %s117_s24 = scalar_lea.hbm %s170_s1, 32 }
  0x25   :  { %p118_p13 = scmp.ne.s32.totalorder %s170_s1, %s117_s24  ;;  %p121_p0 = scmp.lt.u32.totalorder %s117_s24, %s170_s1 }
  0x27   :  { %p123_p1 = pnand %p121_p0, %p118_p13 }
  0x29   :  { %126 = shalt.err (!%p123_p1)
}
  0x2a   :  { %73 = dma.vmem_to_hbm [thread:$0]  %s71_s21, 32, %s170_s1, [#allocation4]  }
  0x2b   :  { %129 = dma.done.wait [#allocation4], 32  }
  0x2c   :  { %130 = vsyncadd [#allocation4], 4294967264 }
  0x2d   :  { %77 = vsyncpa [#allocation3], 1 }
  0x2e   :  { %78 = vsyncpa [#allocation4], 1 }

</bundles_post_ra>
